<compile_context>
chip_gen: v7x
topology: tpu7x:2x2x1
jax: 0.10.0
libtpu: 0.0.40
codegen_flags: <defaults>
</compile_context>

<pallas_src>
import jax
import jax.numpy as jnp
from jax.experimental import pallas as pl
from jax.experimental.pallas import tpu as pltpu


def mlp_kernel(x_ref, w1_ref, b1_ref, w2_ref, b2_ref, o_ref):
    # Cast x to bf16 in-kernel (VPU), immediately before the MXU dot; the DMA
    # moved only the original f32 bytes (no extra wrapper pad/cast pass).
    x = x_ref[...].astype(jnp.bfloat16)
    # Layer 1: (TB, D) @ (D, H) on the MXU, f32 accumulate; bias + ReLU in f32.
    h = jnp.dot(x, w1_ref[...], preferred_element_type=jnp.float32)
    h = jnp.maximum(h + b1_ref[...], 0.0)
    # Layer 2: (TB, H) @ (H, A) on the MXU, f32 accumulate; bias in f32.
    out = jnp.dot(h.astype(jnp.bfloat16), w2_ref[...],
                  preferred_element_type=jnp.float32)
    o_ref[...] = (out + b2_ref[...]).astype(o_ref.dtype)


def _round_up(n, m):
    return ((n + m - 1) // m) * m


def _vmem_capacity_bytes():
    try:
        return int(pltpu.get_tpu_info().vmem_capacity_bytes)
    except Exception:
        return 64 * 1024 * 1024  # conservative (v7x per-TC VMEM)


def prepare_params(w1, b1, w2, b2):
    """One-time cast + zero-pad of the Linear params (hoisted out of forward).

    Weights are stored (in_features, out_features) so the hot path is x @ W
    (equivalent to PyTorch's x @ W.T with its (out, in) layout).  Explicit
    zero fill: padded contraction rows/cols must contribute exactly 0."""
    D, H = w1.shape
    A = w2.shape[1]
    D_pad = _round_up(D, 128)
    H_pad = _round_up(H, 128)
    A_pad = _round_up(A, 128)
    w1_p = jnp.zeros((D_pad, H_pad), jnp.bfloat16).at[:D, :H].set(
        w1.astype(jnp.bfloat16))
    w2_p = jnp.zeros((H_pad, A_pad), jnp.bfloat16).at[:H, :A].set(
        w2.astype(jnp.bfloat16))
    b1_p = jnp.zeros((1, H_pad), jnp.float32).at[:, :H].set(
        b1.reshape(1, H).astype(jnp.float32))
    b2_p = jnp.zeros((1, A_pad), jnp.float32).at[:, :A].set(
        b2.reshape(1, A).astype(jnp.float32))
    return w1_p, b1_p, w2_p, b2_p, A


def mlp_forward(x, params, *, max_batch_tile=512):
    """x: [B, ...] float32; params from prepare_params().
    Returns [B, output_dim] float32 logits (== PyTorch MLP.forward)."""
    w1_p, b1_p, w2_p, b2_p, out_dim = params
    B = x.shape[0]
    x_flat = x.reshape(B, -1).astype(jnp.float32)     # torch.flatten(x, 1, -1)
    D = x_flat.shape[1]
    D_pad, H_pad = w1_p.shape
    A_pad = w2_p.shape[1]
    assert D <= D_pad, "x feature dim larger than prepared params"

    # Only materialize a padded copy of x when the feature dim needs it
    # (D % 128 != 0); otherwise the kernel reads the flattened f32 x directly.
    if D != D_pad:
        x_p = jnp.zeros((B, D_pad), jnp.float32).at[:, :D].set(x_flat)
    else:
        x_p = x_flat

    # Batch tile: target large lane/sublane-dense tiles; keep >= 2 grid steps
    # for large B (v7x megacore) while minimizing tail waste.  Tiny batches
    # use a single full-batch block (full-dim blocks need no 8-row alignment).
    if B <= 16:
        TB = B
    else:
        TB = min(max_batch_tile, _round_up((B + 1) // 2, 16))
    grid = (pl.cdiv(B, TB),)

    def build(weight_mode):
        def const_spec(shape):
            # Weights/biases: constant block index -> fetched once, resident.
            if weight_mode is None:
                return pl.BlockSpec(shape, lambda i: (0, 0))
            return pl.BlockSpec(shape, lambda i: (0, 0),
                                pipeline_mode=weight_mode)

        in_specs = [
            pl.BlockSpec((TB, D_pad), lambda i: (i, 0)),   # x (batch-tiled)
            const_spec((D_pad, H_pad)),                    # w1 (resident)
            const_spec((1, H_pad)),                        # b1 (resident)
            const_spec((H_pad, A_pad)),                    # w2 (resident)
            const_spec((1, A_pad)),                        # b2 (resident)
        ]
        out_specs = pl.BlockSpec((TB, A_pad), lambda i: (i, 0))

        weight_bufs = 1 if weight_mode is not None else 2
        weight_bytes = (w1_p.size + w2_p.size) * 2 + (b1_p.size + b2_p.size) * 4
        vmem_need = (weight_bufs * weight_bytes
                     + 2 * TB * D_pad * 4      # double-buffered f32 x tiles
                     + 2 * TB * A_pad * 4)     # double-buffered f32 out tiles
        vmem_cap = _vmem_capacity_bytes()
        vmem_limit = int(min(max(2 * vmem_need, 32 * 1024 * 1024),
                             (3 * vmem_cap) // 4))

        flops = 2 * B * (D_pad * H_pad + H_pad * A_pad)
        bytes_accessed = (x_p.size * 4 + weight_bytes + B * A_pad * 4)

        return pl.pallas_call(
            mlp_kernel,
            out_shape=jax.ShapeDtypeStruct((B, A_pad), jnp.float32),
            grid=grid,
            in_specs=in_specs,
            out_specs=out_specs,
            compiler_params=pltpu.CompilerParams(
                dimension_semantics=("parallel",),
                vmem_limit_bytes=vmem_limit,
            ),
            cost_estimate=pl.CostEstimate(
                flops=flops, transcendentals=0, bytes_accessed=bytes_accessed),
        )

    try:
        out_padded = build(pl.Buffered(1))(x_p, w1_p, b1_p, w2_p, b2_p)
    except Exception:
        # Fallback: default (double) buffering for the resident weights.
        out_padded = build(None)(x_p, w1_p, b1_p, w2_p, b2_p)

    return out_padded[:, :out_dim]


def init_params(key, input_dim, output_dim, n_hidden):
    """Deterministic init mimicking nn.Linear's uniform(-1/sqrt(fan_in), ...)."""
    k1, k2, k3, k4 = jax.random.split(key, 4)
    lim1 = 1.0 / jnp.sqrt(input_dim)
    lim2 = 1.0 / jnp.sqrt(n_hidden)
    w1 = jax.random.uniform(k1, (input_dim, n_hidden), jnp.float32, -lim1, lim1)
    b1 = jax.random.uniform(k2, (1, n_hidden), jnp.float32, -lim1, lim1)
    w2 = jax.random.uniform(k3, (n_hidden, output_dim), jnp.float32, -lim2, lim2)
    b2 = jax.random.uniform(k4, (1, output_dim), jnp.float32, -lim2, lim2)
    return w1, b1, w2, b2


if __name__ == "__main__":
    # Small image-like NCHW input consistent with flatten(x, 1, -1).
    B, C, Hsp, Wsp = 2, 4, 16, 16
    input_dim = C * Hsp * Wsp      # 1024 (multiple of 128 -> no x padding)
    n_hidden = 32
    output_dim = 10

    key = jax.random.PRNGKey(0)
    kx, kp = jax.random.split(key)
    x = jax.random.normal(kx, (B, C, Hsp, Wsp), jnp.float32)
    w1, b1, w2, b2 = init_params(kp, input_dim, output_dim, n_hidden)

    params = prepare_params(w1, b1, w2, b2)   # one-time param prep (hoisted)
    out = mlp_forward(x, params)
    out = jax.block_until_ready(out)
    assert out.shape == (B, output_dim)

    # Reference 1: same bf16-operand / f32-accumulate math in plain JAX (tight).
    xf = x.reshape(B, -1)
    ref_h = jnp.maximum(
        jnp.dot(xf.astype(jnp.bfloat16), w1.astype(jnp.bfloat16),
                preferred_element_type=jnp.float32) + b1, 0.0)
    ref_bf16 = jnp.dot(ref_h.astype(jnp.bfloat16), w2.astype(jnp.bfloat16),
                       preferred_element_type=jnp.float32) + b2
    # Reference 2: full-f32 PyTorch semantics (looser tolerance: bf16 operands).
    ref_f32 = jnp.maximum(xf @ w1 + b1, 0.0) @ w2 + b2

    assert jnp.allclose(out, ref_bf16, atol=1e-2, rtol=1e-2), \
        float(jnp.max(jnp.abs(out - ref_bf16)))
    assert jnp.allclose(out, ref_f32, atol=5e-2, rtol=5e-2), \
        float(jnp.max(jnp.abs(out - ref_f32)))

    print("KERNEL_OK")
</pallas_src>

<mosaic_0001>
module attributes {stable_mosaic.version = 11 : i64} {
  func.func @mlp_kernel(%arg0: i32, %arg1: memref<2x1024xf32, #tpu.memory_space<vmem>>, %arg2: memref<1024x128xbf16, #tpu.memory_space<vmem>>, %arg3: memref<1x128xf32, #tpu.memory_space<vmem>>, %arg4: memref<128x128xbf16, #tpu.memory_space<vmem>>, %arg5: memref<1x128xf32, #tpu.memory_space<vmem>>, %arg6: memref<2x128xf32, #tpu.memory_space<vmem>>) attributes {dimension_semantics = [#tpu.dimension_semantics<parallel>], iteration_bounds = array<i64: 1>, scalar_prefetch = 0 : i64, scratch_operands = 0 : i64, tpu.core_type = #tpu.core_type<tc>, window_params = [{transform_indices = @transform_0, window_bounds = array<i64: 2, 1024>}, {pipeline_mode = #tpu.pipeline_mode<synchronous>, transform_indices = @transform_1, window_bounds = array<i64: 1024, 128>}, {pipeline_mode = #tpu.pipeline_mode<synchronous>, transform_indices = @transform_2, window_bounds = array<i64: 1, 128>}, {pipeline_mode = #tpu.pipeline_mode<synchronous>, transform_indices = @transform_3, window_bounds = array<i64: 128, 128>}, {pipeline_mode = #tpu.pipeline_mode<synchronous>, transform_indices = @transform_4, window_bounds = array<i64: 1, 128>}, {transform_indices = @transform_5, window_bounds = array<i64: 2, 128>}]} {
    %c0 = arith.constant 0 : index
    %c0_0 = arith.constant 0 : index
    %0 = vector.load %arg1[%c0, %c0_0] : memref<2x1024xf32, #tpu.memory_space<vmem>>, vector<2x1024xf32>
    %1 = arith.truncf %0 : vector<2x1024xf32> to vector<2x1024xbf16>
    %c0_1 = arith.constant 0 : index
    %c0_2 = arith.constant 0 : index
    %2 = vector.load %arg2[%c0_1, %c0_2] : memref<1024x128xbf16, #tpu.memory_space<vmem>>, vector<1024x128xbf16>
    %cst = arith.constant dense<0.000000e+00> : vector<2x128xf32>
    %3 = tpu.matmul %1, %2, %cst {dimension_numbers = #tpu.dot_dimension_numbers<[1], [0], [0], [1], [0, 0, 1, 1], [], []>} : vector<2x1024xbf16>, vector<1024x128xbf16>, vector<2x128xf32> -> vector<2x128xf32>
    %c0_3 = arith.constant 0 : index
    %c0_4 = arith.constant 0 : index
    %4 = vector.load %arg3[%c0_3, %c0_4] : memref<1x128xf32, #tpu.memory_space<vmem>>, vector<1x128xf32>
    %5 = vector.broadcast %4 : vector<1x128xf32> to vector<2x128xf32>
    %6 = arith.addf %3, %5 : vector<2x128xf32>
    %cst_5 = arith.constant 0.000000e+00 : f32
    %7 = vector.broadcast %cst_5 : f32 to vector<2x128xf32>
    %8 = arith.maximumf %6, %7 : vector<2x128xf32>
    %9 = arith.truncf %8 : vector<2x128xf32> to vector<2x128xbf16>
    %c0_6 = arith.constant 0 : index
    %c0_7 = arith.constant 0 : index
    %10 = vector.load %arg4[%c0_6, %c0_7] : memref<128x128xbf16, #tpu.memory_space<vmem>>, vector<128x128xbf16>
    %cst_8 = arith.constant dense<0.000000e+00> : vector<2x128xf32>
    %11 = tpu.matmul %9, %10, %cst_8 {dimension_numbers = #tpu.dot_dimension_numbers<[1], [0], [0], [1], [0, 0, 1, 1], [], []>} : vector<2x128xbf16>, vector<128x128xbf16>, vector<2x128xf32> -> vector<2x128xf32>
    %c0_9 = arith.constant 0 : index
    %c0_10 = arith.constant 0 : index
    %12 = vector.load %arg5[%c0_9, %c0_10] : memref<1x128xf32, #tpu.memory_space<vmem>>, vector<1x128xf32>
    %13 = vector.broadcast %12 : vector<1x128xf32> to vector<2x128xf32>
    %14 = arith.addf %11, %13 : vector<2x128xf32>
    %c0_11 = arith.constant 0 : index
    %c0_12 = arith.constant 0 : index
    %15 = vector.load %arg6[%c0_11, %c0_12] : memref<2x128xf32, #tpu.memory_space<vmem>>, vector<2x128xf32>
    tpu.vector_store %arg6[%c0_11, %c0_12], %14 {strides = array<i32>} : memref<2x128xf32, #tpu.memory_space<vmem>>, vector<2x128xf32>,
    return
  }
  func.func @transform_0(%arg0: i32) -> (i32, i32) {
    %c0_i32 = arith.constant 0 : i32
    %c0_i32_0 = arith.constant 0 : i32
    return %arg0, %c0_i32 : i32, i32
  }
  func.func @transform_1(%arg0: i32) -> (i32, i32) {
    %c0_i32 = arith.constant 0 : i32
    %c0_i32_0 = arith.constant 0 : i32
    %c0_i32_1 = arith.constant 0 : i32
    return %c0_i32, %c0_i32_0 : i32, i32
  }
  func.func @transform_2(%arg0: i32) -> (i32, i32) {
    %c0_i32 = arith.constant 0 : i32
    %c0_i32_0 = arith.constant 0 : i32
    %c0_i32_1 = arith.constant 0 : i32
    return %c0_i32, %c0_i32_0 : i32, i32
  }
  func.func @transform_3(%arg0: i32) -> (i32, i32) {
    %c0_i32 = arith.constant 0 : i32
    %c0_i32_0 = arith.constant 0 : i32
    %c0_i32_1 = arith.constant 0 : i32
    return %c0_i32, %c0_i32_0 : i32, i32
  }
  func.func @transform_4(%arg0: i32) -> (i32, i32) {
    %c0_i32 = arith.constant 0 : i32
    %c0_i32_0 = arith.constant 0 : i32
    %c0_i32_1 = arith.constant 0 : i32
    return %c0_i32, %c0_i32_0 : i32, i32
  }
  func.func @transform_5(%arg0: i32) -> (i32, i32) {
    %c0_i32 = arith.constant 0 : i32
    %c0_i32_0 = arith.constant 0 : i32
    return %arg0, %c0_i32 : i32, i32
  }
}

module attributes {stable_mosaic.version = 11 : i64} {
  func.func @mlp_kernel(%arg0: i32, %arg1: memref<2x1024xf32, #tpu.memory_space<vmem>>, %arg2: memref<1024x128xbf16, #tpu.memory_space<vmem>>, %arg3: memref<1x128xf32, #tpu.memory_space<vmem>>, %arg4: memref<128x128xbf16, #tpu.memory_space<vmem>>, %arg5: memref<1x128xf32, #tpu.memory_space<vmem>>, %arg6: memref<2x128xf32, #tpu.memory_space<vmem>>) attributes {dimension_semantics = [#tpu.dimension_semantics<parallel>], iteration_bounds = array<i64: 1>, scalar_prefetch = 0 : i64, scratch_operands = 0 : i64, tpu.core_type = #tpu.core_type<tc>, window_params = [{transform_indices = @transform_0, window_bounds = array<i64: 2, 1024>}, {pipeline_mode = #tpu.pipeline_mode<synchronous>, transform_indices = @transform_1, window_bounds = array<i64: 1024, 128>}, {pipeline_mode = #tpu.pipeline_mode<synchronous>, transform_indices = @transform_2, window_bounds = array<i64: 1, 128>}, {pipeline_mode = #tpu.pipeline_mode<synchronous>, transform_indices = @transform_3, window_bounds = array<i64: 128, 128>}, {pipeline_mode = #tpu.pipeline_mode<synchronous>, transform_indices = @transform_4, window_bounds = array<i64: 1, 128>}, {transform_indices = @transform_5, window_bounds = array<i64: 2, 128>}]} {
    %c0 = arith.constant 0 : index
    %c0_0 = arith.constant 0 : index
    %0 = vector.load %arg1[%c0, %c0_0] : memref<2x1024xf32, #tpu.memory_space<vmem>>, vector<2x1024xf32>
    %1 = arith.truncf %0 : vector<2x1024xf32> to vector<2x1024xbf16>
    %c0_1 = arith.constant 0 : index
    %c0_2 = arith.constant 0 : index
    %2 = vector.load %arg2[%c0_1, %c0_2] : memref<1024x128xbf16, #tpu.memory_space<vmem>>, vector<1024x128xbf16>
    %cst = arith.constant dense<0.000000e+00> : vector<2x128xf32>
    %3 = tpu.matmul %1, %2, %cst {dimension_numbers = #tpu.dot_dimension_numbers<[1], [0], [0], [1], [0, 0, 1, 1], [], []>} : vector<2x1024xbf16>, vector<1024x128xbf16>, vector<2x128xf32> -> vector<2x128xf32>
    %c0_3 = arith.constant 0 : index
    %c0_4 = arith.constant 0 : index
    %4 = vector.load %arg3[%c0_3, %c0_4] : memref<1x128xf32, #tpu.memory_space<vmem>>, vector<1x128xf32>
    %5 = vector.broadcast %4 : vector<1x128xf32> to vector<2x128xf32>
    %6 = arith.addf %3, %5 : vector<2x128xf32>
    %cst_5 = arith.constant 0.000000e+00 : f32
    %7 = vector.broadcast %cst_5 : f32 to vector<2x128xf32>
    %8 = arith.maximumf %6, %7 : vector<2x128xf32>
    %9 = arith.truncf %8 : vector<2x128xf32> to vector<2x128xbf16>
    %c0_6 = arith.constant 0 : index
    %c0_7 = arith.constant 0 : index
    %10 = vector.load %arg4[%c0_6, %c0_7] : memref<128x128xbf16, #tpu.memory_space<vmem>>, vector<128x128xbf16>
    %cst_8 = arith.constant dense<0.000000e+00> : vector<2x128xf32>
    %11 = tpu.matmul %9, %10, %cst_8 {dimension_numbers = #tpu.dot_dimension_numbers<[1], [0], [0], [1], [0, 0, 1, 1], [], []>} : vector<2x128xbf16>, vector<128x128xbf16>, vector<2x128xf32> -> vector<2x128xf32>
    %c0_9 = arith.constant 0 : index
    %c0_10 = arith.constant 0 : index
    %12 = vector.load %arg5[%c0_9, %c0_10] : memref<1x128xf32, #tpu.memory_space<vmem>>, vector<1x128xf32>
    %13 = vector.broadcast %12 : vector<1x128xf32> to vector<2x128xf32>
    %14 = arith.addf %11, %13 : vector<2x128xf32>
    %c0_11 = arith.constant 0 : index
    %c0_12 = arith.constant 0 : index
    %15 = vector.load %arg6[%c0_11, %c0_12] : memref<2x128xf32, #tpu.memory_space<vmem>>, vector<2x128xf32>
    tpu.vector_store %arg6[%c0_11, %c0_12], %14 {strides = array<i32>} : memref<2x128xf32, #tpu.memory_space<vmem>>, vector<2x128xf32>,
    return
  }
  func.func @transform_0(%arg0: i32) -> (i32, i32) {
    %c0_i32 = arith.constant 0 : i32
    %c0_i32_0 = arith.constant 0 : i32
    return %arg0, %c0_i32 : i32, i32
  }
  func.func @transform_1(%arg0: i32) -> (i32, i32) {
    %c0_i32 = arith.constant 0 : i32
    %c0_i32_0 = arith.constant 0 : i32
    %c0_i32_1 = arith.constant 0 : i32
    return %c0_i32, %c0_i32_0 : i32, i32
  }
  func.func @transform_2(%arg0: i32) -> (i32, i32) {
    %c0_i32 = arith.constant 0 : i32
    %c0_i32_0 = arith.constant 0 : i32
    %c0_i32_1 = arith.constant 0 : i32
    return %c0_i32, %c0_i32_0 : i32, i32
  }
  func.func @transform_3(%arg0: i32) -> (i32, i32) {
    %c0_i32 = arith.constant 0 : i32
    %c0_i32_0 = arith.constant 0 : i32
    %c0_i32_1 = arith.constant 0 : i32
    return %c0_i32, %c0_i32_0 : i32, i32
  }
  func.func @transform_4(%arg0: i32) -> (i32, i32) {
    %c0_i32 = arith.constant 0 : i32
    %c0_i32_0 = arith.constant 0 : i32
    %c0_i32_1 = arith.constant 0 : i32
    return %c0_i32, %c0_i32_0 : i32, i32
  }
  func.func @transform_5(%arg0: i32) -> (i32, i32) {
    %c0_i32 = arith.constant 0 : i32
    %c0_i32_0 = arith.constant 0 : i32
    return %arg0, %c0_i32 : i32, i32
  }
}

</mosaic_0001>

<bundles_post_ra>
// kernel: tpu_custom_call.1
= control target key start
LH: loop header
LB: loop body
LE: loop exit
PB: predicated region body
PF: predicated region fallthrough
CT: control target
= control target key end

     0   :  { %10 = vsyncpa [#allocation3], 0  ;;  %s1397_s0 = inlined_call_operand.hbm [shape: f32[2,1024], index: 0, kind: input, shape index: {}]   ;;  %s1398_s1 = inlined_call_operand.hbm [shape: bf16[1024,128], index: 1, kind: input, shape index: {}]   ;;  %s1399_s2 = inlined_call_operand.vmem [shape: f32[1,128], index: 2, kind: input, shape index: {}]   ;;  %s1400_s3 = inlined_call_operand.hbm [shape: bf16[128,128], index: 3, kind: input, shape index: {}]   ;;  %s1401_s4 = inlined_call_operand.vmem [shape: f32[1,128], index: 4, kind: input, shape index: {}]   ;;  %s1402_s5 = inlined_call_operand.hbm [shape: f32[2,128], index: 5, kind: output, shape index: {}]  }
   0x1   :  { %11 = vsyncpa [#allocation6], 0 }
   0x2   :  { %12 = vsyncpa [#allocation4], 0  ;;  %s1292_s18 = smov [#allocation5]   ;;  %s1198_s22 = scalar_lea.hbm %s1398_s1, 8192 }
   0x3   :  { %s28_s19 = sshll.u32 %s1292_s18, 4  ;;  %p1199_p0 = scmp.ne.s32.totalorder %s1398_s1, %s1198_s22  ;;  %s29_s19 = int_to_ptr.vmem [resolvable:$true] %s28_s19 }
   0x4   :  { %p1202_p1 = scmp.lt.u32.totalorder %s1198_s22, %s1398_s1 }
   0x6   :  { %p1204_p2 = pnand %p1202_p1, %p1199_p0 }
   0x8   :  { %1207 = shalt.err (!%p1204_p2)
}
   0x9   :  { %s1208_s27 = scalar_lea.vmem %s29_s19, 8192  ;;  %p1213_p4 = scmp.lt.s32.totalorder %s29_s19, %s29_s19 }
   0xa   :  { %p1209_p3 = scmp.ne.s32.totalorder %s29_s19, %s1208_s27  ;;  %p1214_p5 = scmp.lt.s32.totalorder %s1208_s27, %s1208_s27 }
   0xc   :  { %p1215_p6 = por %p1214_p5, %p1213_p4 }
   0xe   :  { %p1216_p7 = pnand %p1215_p6, %p1209_p3 }
  0x10   :  { %1219 = shalt.err (!%p1216_p7)
}
  0x11   :  { %s1293_s28 = smov 64   ;;  %s1294_s29 = smov 4  }
  0x12   :  { %34 = dma.hbm_to_vmem [thread:$0]  %s1398_s1, 8192, %s29_s19, [#allocation6], %s1293_s28, %s1293_s28, %s1294_s29  }
  0x13   :  { %s1295_s7 = smov [#allocation2]   ;;  %s1296_s9 = smov [#allocation7]  }
  0x14   :  { %s19_s8 = sshll.u32 %s1295_s7, 4  ;;  %s42_s10 = sshll.u32 %s1296_s9, 4  ;;  %s20_s8 = int_to_ptr.vmem [resolvable:$true] %s19_s8  ;;  %s43_s10 = int_to_ptr.vmem [resolvable:$true] %s42_s10 }
  0x15   :  { %s1220_s13 = scalar_lea.hbm %s1397_s0, 256 }
  0x16   :  { %p1221_p8 = scmp.ne.s32.totalorder %s1397_s0, %s1220_s13  ;;  %p1224_p9 = scmp.lt.u32.totalorder %s1220_s13, %s1397_s0 }
  0x18   :  { %p1226_p10 = pnand %p1224_p9, %p1221_p8 }
  0x1a   :  { %1229 = shalt.err (!%p1226_p10)
}
  0x1b   :  { %s1230_s1 = scalar_lea.vmem %s20_s8, 256  ;;  %p1235_p12 = scmp.lt.s32.totalorder %s20_s8, %s20_s8 }
  0x1c   :  { %p1231_p11 = scmp.ne.s32.totalorder %s20_s8, %s1230_s1  ;;  %p1236_p13 = scmp.lt.s32.totalorder %s1230_s1, %s1230_s1 }
  0x1e   :  { %p1237_p0 = por %p1236_p13, %p1235_p12 }
  0x20   :  { %p1238_p1 = pnand %p1237_p0, %p1231_p11 }
  0x22   :  { %1241 = shalt.err (!%p1238_p1)
}
  0x23   :  { %22 = dma.hbm_to_vmem [thread:$0]  %s1397_s0, 256, %s20_s8, [#allocation3]  }
  0x24   :  { %s1242_s22 = scalar_lea.hbm %s1400_s3, 1024 }
  0x25   :  { %p1243_p2 = scmp.ne.s32.totalorder %s1400_s3, %s1242_s22  ;;  %p1246_p3 = scmp.lt.u32.totalorder %s1242_s22, %s1400_s3 }
  0x27   :  { %p1248_p4 = pnand %p1246_p3, %p1243_p2 }
  0x29   :  { %1251 = shalt.err (!%p1248_p4)
}
  0x2a   :  { %s1252_s27 = scalar_lea.vmem %s43_s10, 1024  ;;  %p1257_p6 = scmp.lt.s32.totalorder %s43_s10, %s43_s10 }
  0x2b   :  { %p1253_p5 = scmp.ne.s32.totalorder %s43_s10, %s1252_s27  ;;  %p1258_p7 = scmp.lt.s32.totalorder %s1252_s27, %s1252_s27 }
  0x2d   :  { %p1259_p8 = por %p1258_p7, %p1257_p6 }
  0x2f   :  { %p1260_p9 = pnand %p1259_p8, %p1253_p5 }
  0x31   :  { %1263 = shalt.err (!%p1260_p9)
}
  0x32   :  { %48 = dma.hbm_to_vmem [thread:$0]  %s1400_s3, 1024, %s43_s10, [#allocation6], %s1293_s28, %s1293_s28, %s1294_s29  }
  0x33   :  { %1286 = dma.done.wait [#allocation3], 256  }
  0x34   :  { %1287 = vsyncadd [#allocation3], 4294967040 }
  0x35   :  { %1288 = dma.done.wait [#allocation6], 9216  }
  0x36   :  { %1289 = vsyncadd [#allocation6], 4294958080  ;;  %v1124_v0 = vld [vmem:[#allocation5 + $0x40] sm:$0xff]   ;;  %v1128_v4 = vld [vmem:[#allocation5 + $0x48] sm:$0xff]   ;;  %v1297_v22 = vmov 1983009808   ;;  %v69_v24 = vlaneseq }
  0x37   :  { %v1125_v1 = vld [vmem:[#allocation5 + $0xc0] sm:$0xff]   ;;  %998 = vmatprep.subr.bf16.mxu0 %v1124_v0  ;;  %v1129_v5 = vld [vmem:[#allocation5 + $0xc8] sm:$0xff]   ;;  %v1132_v8 = vld [vmem:[#allocation5 + $0x50] sm:$0xff]   ;;  %v67_v23 = vunpack.c.l.s4 %v1297_v22  ;;  %vm1299_vm0 = vmmov 0   ;;  %s1300_s6 = smov [#allocation8]  }
  0x38   :  { %v1126_v2 = vld [vmem:[#allocation5] sm:$0xff]   ;;  %1020 = vmatprep.subr.bf16.mxu1 %v1125_v1  ;;  %v1130_v6 = vld [vmem:[#allocation5 + $0x8] sm:$0xff]   ;;  %v1133_v9 = vld [vmem:[#allocation5 + $0xd0] sm:$0xff]   ;;  %v70_v30 = vshrl.u32 %v69_v24, 7  ;;  %s914_s7 = sshll.u32 %s1300_s6, 4  ;;  %s915_s7 = int_to_ptr.vmem [resolvable:$true] %s914_s7 }
  0x39   :  { %v1127_v3 = vld [vmem:[#allocation5 + $0x80] sm:$0xff]   ;;  %999 = vmatpush3.bf16.msra.mxu0 %v1126_v2  ;;  %v1131_v7 = vld [vmem:[#allocation5 + $0x88] sm:$0xff]   ;;  %v1134_v10 = vld [vmem:[#allocation5 + $0x10] sm:$0xff]   ;;  %v68_v29 = vunpack.c.0.s8 %v67_v23  ;;  %s1264_s8 = scalar_lea.vmem %s915_s7, 32  ;;  %p1269_p11 = scmp.lt.s32.totalorder %s915_s7, %s915_s7 }
  0x3a   :  { %1021 = vmatpush3.bf16.msra.mxu1 %v1127_v3  ;;  %1000 = vmatprep.subr.bf16.mxu0 %v1128_v4  ;;  %v1135_v11 = vld [vmem:[#allocation5 + $0x90] sm:$0xff]   ;;  %v1136_v12 = vld [vmem:[#allocation5 + $0x58] sm:$0xff]   ;;  %v1140_v16 = vld [vmem:[#allocation5 + $0x60] sm:$0xff]   ;;  %p1265_p10 = scmp.ne.s32.totalorder %s915_s7, %s1264_s8  ;;  %p1270_p12 = scmp.lt.s32.totalorder %s1264_s8, %s1264_s8 }
  0x3b   :  { %1022 = vmatprep.subr.bf16.mxu1 %v1129_v5  ;;  %v1137_v13 = vld [vmem:[#allocation5 + $0xd8] sm:$0xff]   ;;  %v1141_v17 = vld [vmem:[#allocation5 + $0xe0] sm:$0xff]   ;;  %v1144_v20 = vld [vmem:[#allocation5 + $0x68] sm:$0xff]   ;;  %v1373_v35 = vsub.s32 %v68_v29, %v70_v30 }
  0x3c   :  { %v1138_v14 = vld [vmem:[#allocation5 + $0x18] sm:$0xff]   ;;  %v1142_v18 = vld [vmem:[#allocation5 + $0x20] sm:$0xff]   ;;  %v1145_v21 = vld [vmem:[#allocation5 + $0xe8] sm:$0xff]   ;;  %p1271_p13 = por %p1270_p12, %p1269_p11 }
  0x3d   :  { %1001 = vmatpush3.bf16.msra.mxu0 %v1130_v6  ;;  %v1139_v15 = vld [vmem:[#allocation5 + $0x98] sm:$0xff]   ;;  %v1143_v19 = vld [vmem:[#allocation5 + $0xa0] sm:$0xff]   ;;  %v1146_v25 = vld [vmem:[#allocation5 + $0x28] sm:$0xff]  }
  0x3e   :  { %1023 = vmatpush3.bf16.msra.mxu1 %v1131_v7  ;;  %1002 = vmatprep.subr.bf16.mxu0 %v1132_v8  ;;  %v1147_v26 = vld [vmem:[#allocation5 + $0xa8] sm:$0xff]   ;;  %v1148_v27 = vld [vmem:[#allocation5 + $0x70] sm:$0xff]   ;;  %v1152_v33 = vld [vmem:[#allocation5 + $0x78] sm:$0xff]   ;;  %p1272_p0 = pnand %p1271_p13, %p1265_p10 }
  0x3f   :  { %1024 = vmatprep.subr.bf16.mxu1 %v1133_v9  ;;  %v1149_v28 = vld [vmem:[#allocation5 + $0xf0] sm:$0xff]   ;;  %v1153_v34 = vld [vmem:[#allocation5 + $0xf8] sm:$0xff]   ;;  %v1157_v41 = vld [vmem:[#allocation5 + $0x140] sm:$0xff]  }
  0x40   :  { %v1150_v31 = vld [vmem:[#allocation5 + $0x30] sm:$0xff]   ;;  %v1154_v36 = vld [vmem:[#allocation5 + $0x38] sm:$0xff]   ;;  %v1158_v42 = vld [vmem:[#allocation5 + $0x1c0] sm:$0xff]  }
  0x41   :  { %1003 = vmatpush3.bf16.msra.mxu0 %v1134_v10  ;;  %v1151_v32 = vld [vmem:[#allocation5 + $0xb0] sm:$0xff]   ;;  %v1155_v37 = vld [vmem:[#allocation5 + $0xb8] sm:$0xff]   ;;  %v1159_v46 = vld [vmem:[#allocation5 + $0x100] sm:$0xff]  }
  0x42   :  { %1025 = vmatpush3.bf16.msra.mxu1 %v1135_v11  ;;  %1004 = vmatprep.subr.bf16.mxu0 %v1136_v12  ;;  %v61_v38 = vld [vmem:[#allocation2] sm:$0xff]  ;;  %v1160_v49 = vld [vmem:[#allocation5 + $0x180] sm:$0xff]   ;;  %v1161_v51 = vld [vmem:[#allocation5 + $0x148] sm:$0xff]  }
  0x43   :  { %1026 = vmatprep.subr.bf16.mxu1 %v1137_v13  ;;  %v72_v39 = vrot.slane %v61_v38, %v1373_v35  ;;  %v65_v40 = vcombine.high %v61_v38, %v61_v38  ;;  %v1162_v53 = vld [vmem:[#allocation5 + $0x1c8] sm:$0xff]   ;;  %v1165_v56 = vld [vmem:[#allocation5 + $0x150] sm:$0xff]   ;;  %v1169_v60 = vld [vmem:[#allocation5 + $0x158] sm:$0xff]  }
  0x44   :  { %v1163_v54 = vld [vmem:[#allocation5 + $0x108] sm:$0xff]   ;;  %v1166_v57 = vld [vmem:[#allocation5 + $0x1d0] sm:$0xff]   ;;  %v1170_v61 = vld [vmem:[#allocation5 + $0x1d8] sm:$0xff]  }
  0x45   :  { %1005 = vmatpush3.bf16.msra.mxu0 %v1138_v14  ;;  %v80_v43 = vcombine.high %v72_v39, %v72_v39  ;;  %v79_v44 = vrot.slane %v65_v40, %v1373_v35  ;;  %v107_v45 = vpack.c.bf16 %v72_v39, %v72_v39  ;;  %v1164_v55 = vld [vmem:[#allocation5 + $0x188] sm:$0xff]   ;;  %v1167_v58 = vld [vmem:[#allocation5 + $0x110] sm:$0xff]   ;;  %v1171_v62 = vld [vmem:[#allocation5 + $0x118] sm:$0xff]  }
  0x46   :  { %1027 = vmatpush3.bf16.msra.mxu1 %v1139_v15  ;;  %1006 = vmatprep.subr.bf16.mxu0 %v1140_v16  ;;  %v1168_v59 = vld [vmem:[#allocation5 + $0x190] sm:$0xff]   ;;  %v1172_v63 = vld [vmem:[#allocation5 + $0x198] sm:$0xff]   ;;  %v1173_v0 = vld [vmem:[#allocation5 + $0x160] sm:$0xff]  }
  0x47   :  { %1028 = vmatprep.subr.bf16.mxu1 %v1141_v17  ;;  %v108_v47 = vpack.c.bf16 %v80_v43, %v80_v43  ;;  %v81_v48 = vcombine.high %v79_v44, %v79_v44  ;;  %v109_v50 = vpack.c.bf16 %v79_v44, %v79_v44  ;;  %v1174_v1 = vld [vmem:[#allocation5 + $0x1e0] sm:$0xff]   ;;  %v1177_v4 = vld [vmem:[#allocation5 + $0x168] sm:$0xff]   ;;  %v1181_v8 = vld [vmem:[#allocation5 + $0x170] sm:$0xff]  }
  0x48   :  { %v1175_v2 = vld [vmem:[#allocation5 + $0x120] sm:$0xff]   ;;  %v1178_v5 = vld [vmem:[#allocation5 + $0x1e8] sm:$0xff]   ;;  %v1182_v9 = vld [vmem:[#allocation5 + $0x1f0] sm:$0xff]  }
  0x49   :  { %1007 = vmatpush3.bf16.msra.mxu0 %v1142_v18  ;;  %666 = vmatprep.mubr.bf16.mxu0 %v108_v47  ;;  %v110_v52 = vpack.c.bf16 %v81_v48, %v81_v48  ;;  %v1176_v3 = vld [vmem:[#allocation5 + $0x1a0] sm:$0xff]   ;;  %v1179_v6 = vld [vmem:[#allocation5 + $0x128] sm:$0xff]   ;;  %v1183_v10 = vld [vmem:[#allocation5 + $0x130] sm:$0xff]  }
  0x4a   :  { %1029 = vmatpush3.bf16.msra.mxu1 %v1143_v19  ;;  %1008 = vmatprep.subr.bf16.mxu0 %v1144_v20  ;;  %v1180_v7 = vld [vmem:[#allocation5 + $0x1a8] sm:$0xff]   ;;  %v1184_v11 = vld [vmem:[#allocation5 + $0x1b0] sm:$0xff]   ;;  %v1185_v12 = vld [vmem:[#allocation5 + $0x178] sm:$0xff]  }
  0x4b   :  { %1030 = vmatprep.subr.bf16.mxu1 %v1145_v21  ;;  %706 = vmatprep.mubr.bf16.mxu1 %v110_v52  ;;  %v1186_v13 = vld [vmem:[#allocation5 + $0x1f8] sm:$0xff]   ;;  %v1192_v29 = vld [vmem:[#allocation7 + $0x10] sm:$0xff]  }
  0x4c   :  { %v1187_v14 = vld [vmem:[#allocation5 + $0x138] sm:$0xff]  }
  0x4d   :  { %1009 = vmatpush3.bf16.msra.mxu0 %v1146_v25  ;;  %v62_v15 = vld [vmem:[#allocation2 + $0x8] sm:$0xff] }
  0x4e   :  { %1031 = vmatpush3.bf16.msra.mxu1 %v1147_v26  ;;  %1010 = vmatprep.subr.bf16.mxu0 %v1148_v27  ;;  %v1188_v16 = vld [vmem:[#allocation5 + $0x1b8] sm:$0xff]   ;;  %v89_v17 = vrot.slane %v62_v15, %v1373_v35  ;;  %v82_v18 = vcombine.high %v62_v15, %v62_v15  ;;  %v1190_v26 = vld [vmem:[#allocation7] sm:$0xff]   ;;  %v1298_v27 = vmov 0.0  }
  0x4f   :  { %1032 = vmatprep.subr.bf16.mxu1 %v1149_v28  ;;  %v1191_v28 = vld [vmem:[#allocation7 + $0x8] sm:$0xff]   ;;  %v1193_v30 = vld [vmem:[#allocation7 + $0x18] sm:$0xff]  }
  0x50   :  { %v97_v19 = vcombine.high %v89_v17, %v89_v17  ;;  %v96_v20 = vrot.slane %v82_v18, %v1373_v35  ;;  %v111_v21 = vpack.c.bf16 %v89_v17, %v89_v17 }
  0x51   :  { %1011 = vmatpush3.bf16.msra.mxu0 %v1150_v31  ;;  %v1194_v31 = vld [vmem:[#allocation7 + $0x20] sm:$0xff]  }
  0x52   :  { %1033 = vmatpush3.bf16.msra.mxu1 %v1151_v32  ;;  %1012 = vmatprep.subr.bf16.mxu0 %v1152_v33  ;;  %v112_v22 = vpack.c.bf16 %v97_v19, %v97_v19  ;;  %v98_v23 = vcombine.high %v96_v20, %v96_v20  ;;  %v113_v24 = vpack.c.bf16 %v96_v20, %v96_v20  ;;  %v1195_v32 = vld [vmem:[#allocation7 + $0x28] sm:$0xff]   ;;  %v1196_v33 = vld [vmem:[#allocation7 + $0x30] sm:$0xff]  }
  0x53   :  { %1034 = vmatprep.subr.bf16.mxu1 %v1153_v34  ;;  %v1197_v34 = vld [vmem:[#allocation7 + $0x38] sm:$0xff]  }
  0x54   :  { %v114_v25 = vpack.c.bf16 %v98_v23, %v98_v23 }
  0x55   :  { %1013 = vmatpush3.bf16.msra.mxu0 %v1154_v36  ;;  %v924_v36 = vld [vmem:[%s1399_s2] ss:$0 sm:$0xff] }
  0x56   :  { %1035 = vmatpush3.bf16.msra.mxu1 %v1155_v37  ;;  %1042 = vmatprep.subr.bf16.mxu0 %v1157_v41 }
  0x57   :  { %1064 = vmatprep.subr.bf16.mxu1 %v1158_v42 }
  0x58   :  { %667 = vmatmul.mubr.bf16.vlgmr.msra.gmra.mrb[0].mxu0 %v107_v45 }
  0x59   :  { %1043 = vmatpush3.bf16.msra.mxu0 %v1159_v46  ;;  %707 = vmatmul.mubr.bf16.vlgmr.msra.gmra.mrb[0].mxu1 %v109_v50 }
  0x5a   :  { %1044 = vmatprep.subr.bf16.mxu0 %v1161_v51  ;;  %1065 = vmatpush3.bf16.msra.mxu1 %v1160_v49 }
  0x5b   :  { %1066 = vmatprep.subr.bf16.mxu1 %v1162_v53  ;;  %746 = vmatprep.mubr.bf16.mxu0 %v112_v22 }
  0x5c   :  { %786 = vmatprep.mubr.bf16.mxu1 %v114_v25 }
  0x5d   :  { %1045 = vmatpush3.bf16.msra.mxu0 %v1163_v54 }
  0x5e   :  { %1046 = vmatprep.subr.bf16.mxu0 %v1165_v56  ;;  %1067 = vmatpush3.bf16.msra.mxu1 %v1164_v55 }
  0x5f   :  { %1068 = vmatprep.subr.bf16.mxu1 %v1166_v57 }
  0x61   :  { %1047 = vmatpush3.bf16.msra.mxu0 %v1167_v58 }
  0x62   :  { %1048 = vmatprep.subr.bf16.mxu0 %v1169_v60  ;;  %1069 = vmatpush3.bf16.msra.mxu1 %v1168_v59 }
  0x63   :  { %1070 = vmatprep.subr.bf16.mxu1 %v1170_v61 }
  0x65   :  { %1049 = vmatpush3.bf16.msra.mxu0 %v1171_v62  ;;  %v989_v62 = vld [vmem:[%s1401_s4] ss:$0 sm:$0xff] }
  0x66   :  { %1050 = vmatprep.subr.bf16.mxu0 %v1173_v0  ;;  %1071 = vmatpush3.bf16.msra.mxu1 %v1172_v63 }
  0x67   :  { %1072 = vmatprep.subr.bf16.mxu1 %v1174_v1 }
  0x69   :  { %1051 = vmatpush3.bf16.msra.mxu0 %v1175_v2 }
  0x6a   :  { %1052 = vmatprep.subr.bf16.mxu0 %v1177_v4  ;;  %1073 = vmatpush3.bf16.msra.mxu1 %v1176_v3 }
  0x6b   :  { %1074 = vmatprep.subr.bf16.mxu1 %v1178_v5 }
  0x6d   :  { %1053 = vmatpush3.bf16.msra.mxu0 %v1179_v6 }
  0x6e   :  { %1054 = vmatprep.subr.bf16.mxu0 %v1181_v8  ;;  %1075 = vmatpush3.bf16.msra.mxu1 %v1180_v7 }
  0x6f   :  { %1076 = vmatprep.subr.bf16.mxu1 %v1182_v9 }
  0x71   :  { %1055 = vmatpush3.bf16.msra.mxu0 %v1183_v10 }
  0x72   :  { %1056 = vmatprep.subr.bf16.mxu0 %v1185_v12  ;;  %1077 = vmatpush3.bf16.msra.mxu1 %v1184_v11 }
  0x73   :  { %1078 = vmatprep.subr.bf16.mxu1 %v1186_v13 }
  0x75   :  { %1057 = vmatpush3.bf16.msra.mxu0 %v1187_v14 }
  0x76   :  { %1079 = vmatpush3.bf16.msra.mxu1 %v1188_v16  ;;  %1095 = vmatprep.subr.bf16.mxu0 %v1298_v27 }
  0x78   :  { %747 = vmatmul.mubr.bf16.vlgmr.msra.gmra.mrb[4].mxu0 %v111_v21 }
  0x79   :  { %787 = vmatmul.mubr.bf16.vlgmr.msra.gmra.mrb[4].mxu1 %v113_v24  ;;  %1096 = vmatpush3.bf16.msra.mxu0 %v1190_v26 }
  0x7a   :  { %1097 = vmatprep.subr.bf16.mxu0 %v1298_v27  ;;  %1111 = vmatprep.mubr.msk.bf16.mxu0 %vm1299_vm0, %v1298_v27 }
  0x7d   :  { %1098 = vmatpush3.bf16.msra.mxu0 %v1191_v28 }
  0x7e   :  { %1099 = vmatprep.subr.bf16.mxu0 %v1298_v27 }
  0x81   :  { %1100 = vmatpush3.bf16.msra.mxu0 %v1192_v29 }
  0x82   :  { %1101 = vmatprep.subr.bf16.mxu0 %v1298_v27 }
  0x85   :  { %1102 = vmatpush3.bf16.msra.mxu0 %v1193_v30 }
  0x86   :  { %1103 = vmatprep.subr.bf16.mxu0 %v1298_v27 }
  0x89   :  { %1104 = vmatpush3.bf16.msra.mxu0 %v1194_v31 }
  0x8a   :  { %1105 = vmatprep.subr.bf16.mxu0 %v1298_v27 }
  0x8d   :  { %1106 = vmatpush3.bf16.msra.mxu0 %v1195_v32 }
  0x8e   :  { %1107 = vmatprep.subr.bf16.mxu0 %v1298_v27 }
  0x91   :  { %1108 = vmatpush3.bf16.msra.mxu0 %v1196_v33 }
  0x92   :  { %1109 = vmatprep.subr.bf16.mxu0 %v1298_v27 }
  0x95   :  { %1110 = vmatpush3.bf16.msra.mxu0 %v1197_v34 }
 0x12b   :  { %v1014_v35 = vpop.f32.mrb[0].mxu0 }
 0x12c   :  { %v1015_v37 = vpop.f32.mrb[1].mxu0  ;;  %v1036_v38 = vpop.f32.mrb[0].mxu1 }
 0x12d   :  { %v1016_v39 = vadd.f32 %v1015_v37, %v1014_v35  ;;  %v1017_v40 = vpop.f32.mrb[2].mxu0  ;;  %v1037_v41 = vpop.f32.mrb[1].mxu1 }
 0x12e   :  { %v1018_v42 = vpop.f32.mrb[3].mxu0  ;;  %v1038_v44 = vadd.f32 %v1037_v41, %v1036_v38  ;;  %v1039_v45 = vpop.f32.mrb[2].mxu1 }
 0x12f   :  { %v669_v43 = vadd.f32 %v1016_v39, %v924_v36  ;;  %v1040_v46 = vpop.f32.mrb[3].mxu1 }
 0x131   :  { %v709_v47 = vadd.f32 %v1038_v44, %v669_v43 }
 0x14b   :  { %v1058_v48 = vpop.f32.mrb[4].mxu0 }
 0x14c   :  { %v1059_v49 = vpop.f32.mrb[5].mxu0  ;;  %v1080_v50 = vpop.f32.mrb[4].mxu1 }
 0x14d   :  { %v1060_v51 = vadd.f32 %v1059_v49, %v1058_v48  ;;  %v1061_v52 = vpop.f32.mrb[6].mxu0  ;;  %v1081_v53 = vpop.f32.mrb[5].mxu1 }
 0x14e   :  { %v1062_v54 = vpop.f32.mrb[7].mxu0  ;;  %v1082_v56 = vadd.f32 %v1081_v53, %v1080_v50  ;;  %v1083_v57 = vpop.f32.mrb[6].mxu1 }
 0x14f   :  { %v749_v55 = vadd.f32 %v1060_v51, %v709_v47  ;;  %v1084_v58 = vpop.f32.mrb[7].mxu1 }
 0x151   :  { %v789_v59 = vadd.f32 %v1082_v56, %v749_v55 }
 0x153   :  { %v794_v60 = vmax.f32 %v789_v59, 0.0 }
 0x155   :  { %v795_v61 = vpack.c.bf16 %v794_v60, %v794_v60 }
 0x157   :  { %1112 = vmatmul.mubr.bf16.vlgmr.msra.gmra.mrb[8].mxu0 %v795_v61 }
 0x22a   :  { %v901_v63 = vpop.f32.mrb[8].mxu0 }
 0x22b   :  { %v902_v0 = vadd.f32 %v989_v62, %v901_v63  ;;  %v1113_v1 = vpop.f32.mrb[9].mxu0 }
 0x22c   :  { %v904_v2 = vpop.f32.mrb[10].mxu0 }
 0x22d   :  { %907 = vst [vmem:[#allocation8] sm:$0x3] %v902_v0  ;;  %v1114_v3 = vpop.f32.mrb[11].mxu0 }
 0x22e   :  { %1275 = shalt.err (!%p1272_p0)
}
 0x22f   :  { %s1276_s4 = scalar_lea.hbm %s1402_s5, 32 }
 0x230   :  { %p1277_p1 = scmp.ne.s32.totalorder %s1402_s5, %s1276_s4  ;;  %p1280_p2 = scmp.lt.u32.totalorder %s1276_s4, %s1402_s5 }
 0x232   :  { %p1282_p3 = pnand %p1280_p2, %p1277_p1 }
 0x234   :  { %1285 = shalt.err (!%p1282_p3)
}
 0x235   :  { %917 = dma.vmem_to_hbm [thread:$0]  %s915_s7, 32, %s1402_s5, [#allocation4]  }
 0x236   :  { %1290 = dma.done.wait [#allocation4], 32  }
 0x237   :  { %1291 = vsyncadd [#allocation4], 4294967264 }
 0x238   :  { %921 = vsyncpa [#allocation3], 1 }
 0x239   :  { %922 = vsyncpa [#allocation6], 1 }
 0x23a   :  { %923 = vsyncpa [#allocation4], 1 }

// kernel: tpu_custom_call.1
= control target key start
LH: loop header
LB: loop body
LE: loop exit
PB: predicated region body
PF: predicated region fallthrough
CT: control target
= control target key end

     0   :  { %10 = vsyncpa [#allocation3], 0  ;;  %s1397_s0 = inlined_call_operand.hbm [shape: f32[2,1024], index: 0, kind: input, shape index: {}]   ;;  %s1398_s1 = inlined_call_operand.hbm [shape: bf16[1024,128], index: 1, kind: input, shape index: {}]   ;;  %s1399_s2 = inlined_call_operand.vmem [shape: f32[1,128], index: 2, kind: input, shape index: {}]   ;;  %s1400_s3 = inlined_call_operand.hbm [shape: bf16[128,128], index: 3, kind: input, shape index: {}]   ;;  %s1401_s4 = inlined_call_operand.vmem [shape: f32[1,128], index: 4, kind: input, shape index: {}]   ;;  %s1402_s5 = inlined_call_operand.hbm [shape: f32[2,128], index: 5, kind: output, shape index: {}]  }
   0x1   :  { %11 = vsyncpa [#allocation6], 0 }
   0x2   :  { %12 = vsyncpa [#allocation4], 0  ;;  %s1292_s18 = smov [#allocation5]   ;;  %s1198_s22 = scalar_lea.hbm %s1398_s1, 8192 }
   0x3   :  { %s28_s19 = sshll.u32 %s1292_s18, 4  ;;  %p1199_p0 = scmp.ne.s32.totalorder %s1398_s1, %s1198_s22  ;;  %s29_s19 = int_to_ptr.vmem [resolvable:$true] %s28_s19 }
   0x4   :  { %p1202_p1 = scmp.lt.u32.totalorder %s1198_s22, %s1398_s1 }
   0x6   :  { %p1204_p2 = pnand %p1202_p1, %p1199_p0 }
   0x8   :  { %1207 = shalt.err (!%p1204_p2)
}
   0x9   :  { %s1208_s27 = scalar_lea.vmem %s29_s19, 8192  ;;  %p1213_p4 = scmp.lt.s32.totalorder %s29_s19, %s29_s19 }
   0xa   :  { %p1209_p3 = scmp.ne.s32.totalorder %s29_s19, %s1208_s27  ;;  %p1214_p5 = scmp.lt.s32.totalorder %s1208_s27, %s1208_s27 }
   0xc   :  { %p1215_p6 = por %p1214_p5, %p1213_p4 }
   0xe   :  { %p1216_p7 = pnand %p1215_p6, %p1209_p3 }
  0x10   :  { %1219 = shalt.err (!%p1216_p7)
}
  0x11   :  { %s1293_s28 = smov 64   ;;  %s1294_s29 = smov 4  }
  0x12   :  { %34 = dma.hbm_to_vmem [thread:$0]  %s1398_s1, 8192, %s29_s19, [#allocation6], %s1293_s28, %s1293_s28, %s1294_s29  }
  0x13   :  { %s1295_s7 = smov [#allocation2]   ;;  %s1296_s9 = smov [#allocation7]  }
  0x14   :  { %s19_s8 = sshll.u32 %s1295_s7, 4  ;;  %s42_s10 = sshll.u32 %s1296_s9, 4  ;;  %s20_s8 = int_to_ptr.vmem [resolvable:$true] %s19_s8  ;;  %s43_s10 = int_to_ptr.vmem [resolvable:$true] %s42_s10 }
  0x15   :  { %s1220_s13 = scalar_lea.hbm %s1397_s0, 256 }
  0x16   :  { %p1221_p8 = scmp.ne.s32.totalorder %s1397_s0, %s1220_s13  ;;  %p1224_p9 = scmp.lt.u32.totalorder %s1220_s13, %s1397_s0 }
  0x18   :  { %p1226_p10 = pnand %p1224_p9, %p1221_p8 }
  0x1a   :  { %1229 = shalt.err (!%p1226_p10)
}
  0x1b   :  { %s1230_s1 = scalar_lea.vmem %s20_s8, 256  ;;  %p1235_p12 = scmp.lt.s32.totalorder %s20_s8, %s20_s8 }
  0x1c   :  { %p1231_p11 = scmp.ne.s32.totalorder %s20_s8, %s1230_s1  ;;  %p1236_p13 = scmp.lt.s32.totalorder %s1230_s1, %s1230_s1 }
  0x1e   :  { %p1237_p0 = por %p1236_p13, %p1235_p12 }
  0x20   :  { %p1238_p1 = pnand %p1237_p0, %p1231_p11 }
  0x22   :  { %1241 = shalt.err (!%p1238_p1)
}
  0x23   :  { %22 = dma.hbm_to_vmem [thread:$0]  %s1397_s0, 256, %s20_s8, [#allocation3]  }
  0x24   :  { %s1242_s22 = scalar_lea.hbm %s1400_s3, 1024 }
  0x25   :  { %p1243_p2 = scmp.ne.s32.totalorder %s1400_s3, %s1242_s22  ;;  %p1246_p3 = scmp.lt.u32.totalorder %s1242_s22, %s1400_s3 }
  0x27   :  { %p1248_p4 = pnand %p1246_p3, %p1243_p2 }
  0x29   :  { %1251 = shalt.err (!%p1248_p4)
}
  0x2a   :  { %s1252_s27 = scalar_lea.vmem %s43_s10, 1024  ;;  %p1257_p6 = scmp.lt.s32.totalorder %s43_s10, %s43_s10 }
  0x2b   :  { %p1253_p5 = scmp.ne.s32.totalorder %s43_s10, %s1252_s27  ;;  %p1258_p7 = scmp.lt.s32.totalorder %s1252_s27, %s1252_s27 }
  0x2d   :  { %p1259_p8 = por %p1258_p7, %p1257_p6 }
  0x2f   :  { %p1260_p9 = pnand %p1259_p8, %p1253_p5 }
  0x31   :  { %1263 = shalt.err (!%p1260_p9)
}
  0x32   :  { %48 = dma.hbm_to_vmem [thread:$0]  %s1400_s3, 1024, %s43_s10, [#allocation6], %s1293_s28, %s1293_s28, %s1294_s29  }
  0x33   :  { %1286 = dma.done.wait [#allocation3], 256  }
  0x34   :  { %1287 = vsyncadd [#allocation3], 4294967040 }
  0x35   :  { %1288 = dma.done.wait [#allocation6], 9216  }
  0x36   :  { %1289 = vsyncadd [#allocation6], 4294958080  ;;  %v1124_v0 = vld [vmem:[#allocation5 + $0x40] sm:$0xff]   ;;  %v1128_v4 = vld [vmem:[#allocation5 + $0x48] sm:$0xff]   ;;  %v1297_v22 = vmov 1983009808   ;;  %v69_v24 = vlaneseq }
  0x37   :  { %v1125_v1 = vld [vmem:[#allocation5 + $0xc0] sm:$0xff]   ;;  %998 = vmatprep.subr.bf16.mxu0 %v1124_v0  ;;  %v1129_v5 = vld [vmem:[#allocation5 + $0xc8] sm:$0xff]   ;;  %v1132_v8 = vld [vmem:[#allocation5 + $0x50] sm:$0xff]   ;;  %v67_v23 = vunpack.c.l.s4 %v1297_v22  ;;  %vm1299_vm0 = vmmov 0   ;;  %s1300_s6 = smov [#allocation8]  }
  0x38   :  { %v1126_v2 = vld [vmem:[#allocation5] sm:$0xff]   ;;  %1020 = vmatprep.subr.bf16.mxu1 %v1125_v1  ;;  %v1130_v6 = vld [vmem:[#allocation5 + $0x8] sm:$0xff]   ;;  %v1133_v9 = vld [vmem:[#allocation5 + $0xd0] sm:$0xff]   ;;  %v70_v30 = vshrl.u32 %v69_v24, 7  ;;  %s914_s7 = sshll.u32 %s1300_s6, 4  ;;  %s915_s7 = int_to_ptr.vmem [resolvable:$true] %s914_s7 }
  0x39   :  { %v1127_v3 = vld [vmem:[#allocation5 + $0x80] sm:$0xff]   ;;  %999 = vmatpush3.bf16.msra.mxu0 %v1126_v2  ;;  %v1131_v7 = vld [vmem:[#allocation5 + $0x88] sm:$0xff]   ;;  %v1134_v10 = vld [vmem:[#allocation5 + $0x10] sm:$0xff]   ;;  %v68_v29 = vunpack.c.0.s8 %v67_v23  ;;  %s1264_s8 = scalar_lea.vmem %s915_s7, 32  ;;  %p1269_p11 = scmp.lt.s32.totalorder %s915_s7, %s915_s7 }
  0x3a   :  { %1021 = vmatpush3.bf16.msra.mxu1 %v1127_v3  ;;  %1000 = vmatprep.subr.bf16.mxu0 %v1128_v4  ;;  %v1135_v11 = vld [vmem:[#allocation5 + $0x90] sm:$0xff]   ;;  %v1136_v12 = vld [vmem:[#allocation5 + $0x58] sm:$0xff]   ;;  %v1140_v16 = vld [vmem:[#allocation5 + $0x60] sm:$0xff]   ;;  %p1265_p10 = scmp.ne.s32.totalorder %s915_s7, %s1264_s8  ;;  %p1270_p12 = scmp.lt.s32.totalorder %s1264_s8, %s1264_s8 }
  0x3b   :  { %1022 = vmatprep.subr.bf16.mxu1 %v1129_v5  ;;  %v1137_v13 = vld [vmem:[#allocation5 + $0xd8] sm:$0xff]   ;;  %v1141_v17 = vld [vmem:[#allocation5 + $0xe0] sm:$0xff]   ;;  %v1144_v20 = vld [vmem:[#allocation5 + $0x68] sm:$0xff]   ;;  %v1373_v35 = vsub.s32 %v68_v29, %v70_v30 }
  0x3c   :  { %v1138_v14 = vld [vmem:[#allocation5 + $0x18] sm:$0xff]   ;;  %v1142_v18 = vld [vmem:[#allocation5 + $0x20] sm:$0xff]   ;;  %v1145_v21 = vld [vmem:[#allocation5 + $0xe8] sm:$0xff]   ;;  %p1271_p13 = por %p1270_p12, %p1269_p11 }
  0x3d   :  { %1001 = vmatpush3.bf16.msra.mxu0 %v1130_v6  ;;  %v1139_v15 = vld [vmem:[#allocation5 + $0x98] sm:$0xff]   ;;  %v1143_v19 = vld [vmem:[#allocation5 + $0xa0] sm:$0xff]   ;;  %v1146_v25 = vld [vmem:[#allocation5 + $0x28] sm:$0xff]  }
  0x3e   :  { %1023 = vmatpush3.bf16.msra.mxu1 %v1131_v7  ;;  %1002 = vmatprep.subr.bf16.mxu0 %v1132_v8  ;;  %v1147_v26 = vld [vmem:[#allocation5 + $0xa8] sm:$0xff]   ;;  %v1148_v27 = vld [vmem:[#allocation5 + $0x70] sm:$0xff]   ;;  %v1152_v33 = vld [vmem:[#allocation5 + $0x78] sm:$0xff]   ;;  %p1272_p0 = pnand %p1271_p13, %p1265_p10 }
  0x3f   :  { %1024 = vmatprep.subr.bf16.mxu1 %v1133_v9  ;;  %v1149_v28 = vld [vmem:[#allocation5 + $0xf0] sm:$0xff]   ;;  %v1153_v34 = vld [vmem:[#allocation5 + $0xf8] sm:$0xff]   ;;  %v1157_v41 = vld [vmem:[#allocation5 + $0x140] sm:$0xff]  }
  0x40   :  { %v1150_v31 = vld [vmem:[#allocation5 + $0x30] sm:$0xff]   ;;  %v1154_v36 = vld [vmem:[#allocation5 + $0x38] sm:$0xff]   ;;  %v1158_v42 = vld [vmem:[#allocation5 + $0x1c0] sm:$0xff]  }
  0x41   :  { %1003 = vmatpush3.bf16.msra.mxu0 %v1134_v10  ;;  %v1151_v32 = vld [vmem:[#allocation5 + $0xb0] sm:$0xff]   ;;  %v1155_v37 = vld [vmem:[#allocation5 + $0xb8] sm:$0xff]   ;;  %v1159_v46 = vld [vmem:[#allocation5 + $0x100] sm:$0xff]  }
  0x42   :  { %1025 = vmatpush3.bf16.msra.mxu1 %v1135_v11  ;;  %1004 = vmatprep.subr.bf16.mxu0 %v1136_v12  ;;  %v61_v38 = vld [vmem:[#allocation2] sm:$0xff]  ;;  %v1160_v49 = vld [vmem:[#allocation5 + $0x180] sm:$0xff]   ;;  %v1161_v51 = vld [vmem:[#allocation5 + $0x148] sm:$0xff]  }
  0x43   :  { %1026 = vmatprep.subr.bf16.mxu1 %v1137_v13  ;;  %v72_v39 = vrot.slane %v61_v38, %v1373_v35  ;;  %v65_v40 = vcombine.high %v61_v38, %v61_v38  ;;  %v1162_v53 = vld [vmem:[#allocation5 + $0x1c8] sm:$0xff]   ;;  %v1165_v56 = vld [vmem:[#allocation5 + $0x150] sm:$0xff]   ;;  %v1169_v60 = vld [vmem:[#allocation5 + $0x158] sm:$0xff]  }
  0x44   :  { %v1163_v54 = vld [vmem:[#allocation5 + $0x108] sm:$0xff]   ;;  %v1166_v57 = vld [vmem:[#allocation5 + $0x1d0] sm:$0xff]   ;;  %v1170_v61 = vld [vmem:[#allocation5 + $0x1d8] sm:$0xff]  }
  0x45   :  { %1005 = vmatpush3.bf16.msra.mxu0 %v1138_v14  ;;  %v80_v43 = vcombine.high %v72_v39, %v72_v39  ;;  %v79_v44 = vrot.slane %v65_v40, %v1373_v35  ;;  %v107_v45 = vpack.c.bf16 %v72_v39, %v72_v39  ;;  %v1164_v55 = vld [vmem:[#allocation5 + $0x188] sm:$0xff]   ;;  %v1167_v58 = vld [vmem:[#allocation5 + $0x110] sm:$0xff]   ;;  %v1171_v62 = vld [vmem:[#allocation5 + $0x118] sm:$0xff]  }
  0x46   :  { %1027 = vmatpush3.bf16.msra.mxu1 %v1139_v15  ;;  %1006 = vmatprep.subr.bf16.mxu0 %v1140_v16  ;;  %v1168_v59 = vld [vmem:[#allocation5 + $0x190] sm:$0xff]   ;;  %v1172_v63 = vld [vmem:[#allocation5 + $0x198] sm:$0xff]   ;;  %v1173_v0 = vld [vmem:[#allocation5 + $0x160] sm:$0xff]  }
  0x47   :  { %1028 = vmatprep.subr.bf16.mxu1 %v1141_v17  ;;  %v108_v47 = vpack.c.bf16 %v80_v43, %v80_v43  ;;  %v81_v48 = vcombine.high %v79_v44, %v79_v44  ;;  %v109_v50 = vpack.c.bf16 %v79_v44, %v79_v44  ;;  %v1174_v1 = vld [vmem:[#allocation5 + $0x1e0] sm:$0xff]   ;;  %v1177_v4 = vld [vmem:[#allocation5 + $0x168] sm:$0xff]   ;;  %v1181_v8 = vld [vmem:[#allocation5 + $0x170] sm:$0xff]  }
  0x48   :  { %v1175_v2 = vld [vmem:[#allocation5 + $0x120] sm:$0xff]   ;;  %v1178_v5 = vld [vmem:[#allocation5 + $0x1e8] sm:$0xff]   ;;  %v1182_v9 = vld [vmem:[#allocation5 + $0x1f0] sm:$0xff]  }
  0x49   :  { %1007 = vmatpush3.bf16.msra.mxu0 %v1142_v18  ;;  %666 = vmatprep.mubr.bf16.mxu0 %v108_v47  ;;  %v110_v52 = vpack.c.bf16 %v81_v48, %v81_v48  ;;  %v1176_v3 = vld [vmem:[#allocation5 + $0x1a0] sm:$0xff]   ;;  %v1179_v6 = vld [vmem:[#allocation5 + $0x128] sm:$0xff]   ;;  %v1183_v10 = vld [vmem:[#allocation5 + $0x130] sm:$0xff]  }
  0x4a   :  { %1029 = vmatpush3.bf16.msra.mxu1 %v1143_v19  ;;  %1008 = vmatprep.subr.bf16.mxu0 %v1144_v20  ;;  %v1180_v7 = vld [vmem:[#allocation5 + $0x1a8] sm:$0xff]   ;;  %v1184_v11 = vld [vmem:[#allocation5 + $0x1b0] sm:$0xff]   ;;  %v1185_v12 = vld [vmem:[#allocation5 + $0x178] sm:$0xff]  }
  0x4b   :  { %1030 = vmatprep.subr.bf16.mxu1 %v1145_v21  ;;  %706 = vmatprep.mubr.bf16.mxu1 %v110_v52  ;;  %v1186_v13 = vld [vmem:[#allocation5 + $0x1f8] sm:$0xff]   ;;  %v1192_v29 = vld [vmem:[#allocation7 + $0x10] sm:$0xff]  }
  0x4c   :  { %v1187_v14 = vld [vmem:[#allocation5 + $0x138] sm:$0xff]  }
  0x4d   :  { %1009 = vmatpush3.bf16.msra.mxu0 %v1146_v25  ;;  %v62_v15 = vld [vmem:[#allocation2 + $0x8] sm:$0xff] }
  0x4e   :  { %1031 = vmatpush3.bf16.msra.mxu1 %v1147_v26  ;;  %1010 = vmatprep.subr.bf16.mxu0 %v1148_v27  ;;  %v1188_v16 = vld [vmem:[#allocation5 + $0x1b8] sm:$0xff]   ;;  %v89_v17 = vrot.slane %v62_v15, %v1373_v35  ;;  %v82_v18 = vcombine.high %v62_v15, %v62_v15  ;;  %v1190_v26 = vld [vmem:[#allocation7] sm:$0xff]   ;;  %v1298_v27 = vmov 0.0  }
  0x4f   :  { %1032 = vmatprep.subr.bf16.mxu1 %v1149_v28  ;;  %v1191_v28 = vld [vmem:[#allocation7 + $0x8] sm:$0xff]   ;;  %v1193_v30 = vld [vmem:[#allocation7 + $0x18] sm:$0xff]  }
  0x50   :  { %v97_v19 = vcombine.high %v89_v17, %v89_v17  ;;  %v96_v20 = vrot.slane %v82_v18, %v1373_v35  ;;  %v111_v21 = vpack.c.bf16 %v89_v17, %v89_v17 }
  0x51   :  { %1011 = vmatpush3.bf16.msra.mxu0 %v1150_v31  ;;  %v1194_v31 = vld [vmem:[#allocation7 + $0x20] sm:$0xff]  }
  0x52   :  { %1033 = vmatpush3.bf16.msra.mxu1 %v1151_v32  ;;  %1012 = vmatprep.subr.bf16.mxu0 %v1152_v33  ;;  %v112_v22 = vpack.c.bf16 %v97_v19, %v97_v19  ;;  %v98_v23 = vcombine.high %v96_v20, %v96_v20  ;;  %v113_v24 = vpack.c.bf16 %v96_v20, %v96_v20  ;;  %v1195_v32 = vld [vmem:[#allocation7 + $0x28] sm:$0xff]   ;;  %v1196_v33 = vld [vmem:[#allocation7 + $0x30] sm:$0xff]  }
  0x53   :  { %1034 = vmatprep.subr.bf16.mxu1 %v1153_v34  ;;  %v1197_v34 = vld [vmem:[#allocation7 + $0x38] sm:$0xff]  }
  0x54   :  { %v114_v25 = vpack.c.bf16 %v98_v23, %v98_v23 }
  0x55   :  { %1013 = vmatpush3.bf16.msra.mxu0 %v1154_v36  ;;  %v924_v36 = vld [vmem:[%s1399_s2] ss:$0 sm:$0xff] }
  0x56   :  { %1035 = vmatpush3.bf16.msra.mxu1 %v1155_v37  ;;  %1042 = vmatprep.subr.bf16.mxu0 %v1157_v41 }
  0x57   :  { %1064 = vmatprep.subr.bf16.mxu1 %v1158_v42 }
  0x58   :  { %667 = vmatmul.mubr.bf16.vlgmr.msra.gmra.mrb[0].mxu0 %v107_v45 }
  0x59   :  { %1043 = vmatpush3.bf16.msra.mxu0 %v1159_v46  ;;  %707 = vmatmul.mubr.bf16.vlgmr.msra.gmra.mrb[0].mxu1 %v109_v50 }
  0x5a   :  { %1044 = vmatprep.subr.bf16.mxu0 %v1161_v51  ;;  %1065 = vmatpush3.bf16.msra.mxu1 %v1160_v49 }
  0x5b   :  { %1066 = vmatprep.subr.bf16.mxu1 %v1162_v53  ;;  %746 = vmatprep.mubr.bf16.mxu0 %v112_v22 }
  0x5c   :  { %786 = vmatprep.mubr.bf16.mxu1 %v114_v25 }
  0x5d   :  { %1045 = vmatpush3.bf16.msra.mxu0 %v1163_v54 }
  0x5e   :  { %1046 = vmatprep.subr.bf16.mxu0 %v1165_v56  ;;  %1067 = vmatpush3.bf16.msra.mxu1 %v1164_v55 }
  0x5f   :  { %1068 = vmatprep.subr.bf16.mxu1 %v1166_v57 }
  0x61   :  { %1047 = vmatpush3.bf16.msra.mxu0 %v1167_v58 }
  0x62   :  { %1048 = vmatprep.subr.bf16.mxu0 %v1169_v60  ;;  %1069 = vmatpush3.bf16.msra.mxu1 %v1168_v59 }
  0x63   :  { %1070 = vmatprep.subr.bf16.mxu1 %v1170_v61 }
  0x65   :  { %1049 = vmatpush3.bf16.msra.mxu0 %v1171_v62  ;;  %v989_v62 = vld [vmem:[%s1401_s4] ss:$0 sm:$0xff] }
  0x66   :  { %1050 = vmatprep.subr.bf16.mxu0 %v1173_v0  ;;  %1071 = vmatpush3.bf16.msra.mxu1 %v1172_v63 }
  0x67   :  { %1072 = vmatprep.subr.bf16.mxu1 %v1174_v1 }
  0x69   :  { %1051 = vmatpush3.bf16.msra.mxu0 %v1175_v2 }
  0x6a   :  { %1052 = vmatprep.subr.bf16.mxu0 %v1177_v4  ;;  %1073 = vmatpush3.bf16.msra.mxu1 %v1176_v3 }
  0x6b   :  { %1074 = vmatprep.subr.bf16.mxu1 %v1178_v5 }
  0x6d   :  { %1053 = vmatpush3.bf16.msra.mxu0 %v1179_v6 }
  0x6e   :  { %1054 = vmatprep.subr.bf16.mxu0 %v1181_v8  ;;  %1075 = vmatpush3.bf16.msra.mxu1 %v1180_v7 }
  0x6f   :  { %1076 = vmatprep.subr.bf16.mxu1 %v1182_v9 }
  0x71   :  { %1055 = vmatpush3.bf16.msra.mxu0 %v1183_v10 }
  0x72   :  { %1056 = vmatprep.subr.bf16.mxu0 %v1185_v12  ;;  %1077 = vmatpush3.bf16.msra.mxu1 %v1184_v11 }
  0x73   :  { %1078 = vmatprep.subr.bf16.mxu1 %v1186_v13 }
  0x75   :  { %1057 = vmatpush3.bf16.msra.mxu0 %v1187_v14 }
  0x76   :  { %1079 = vmatpush3.bf16.msra.mxu1 %v1188_v16  ;;  %1095 = vmatprep.subr.bf16.mxu0 %v1298_v27 }
  0x78   :  { %747 = vmatmul.mubr.bf16.vlgmr.msra.gmra.mrb[4].mxu0 %v111_v21 }
  0x79   :  { %787 = vmatmul.mubr.bf16.vlgmr.msra.gmra.mrb[4].mxu1 %v113_v24  ;;  %1096 = vmatpush3.bf16.msra.mxu0 %v1190_v26 }
  0x7a   :  { %1097 = vmatprep.subr.bf16.mxu0 %v1298_v27  ;;  %1111 = vmatprep.mubr.msk.bf16.mxu0 %vm1299_vm0, %v1298_v27 }
  0x7d   :  { %1098 = vmatpush3.bf16.msra.mxu0 %v1191_v28 }
  0x7e   :  { %1099 = vmatprep.subr.bf16.mxu0 %v1298_v27 }
  0x81   :  { %1100 = vmatpush3.bf16.msra.mxu0 %v1192_v29 }
  0x82   :  { %1101 = vmatprep.subr.bf16.mxu0 %v1298_v27 }
  0x85   :  { %1102 = vmatpush3.bf16.msra.mxu0 %v1193_v30 }
  0x86   :  { %1103 = vmatprep.subr.bf16.mxu0 %v1298_v27 }
  0x89   :  { %1104 = vmatpush3.bf16.msra.mxu0 %v1194_v31 }
  0x8a   :  { %1105 = vmatprep.subr.bf16.mxu0 %v1298_v27 }
  0x8d   :  { %1106 = vmatpush3.bf16.msra.mxu0 %v1195_v32 }
  0x8e   :  { %1107 = vmatprep.subr.bf16.mxu0 %v1298_v27 }
  0x91   :  { %1108 = vmatpush3.bf16.msra.mxu0 %v1196_v33 }
  0x92   :  { %1109 = vmatprep.subr.bf16.mxu0 %v1298_v27 }
  0x95   :  { %1110 = vmatpush3.bf16.msra.mxu0 %v1197_v34 }
 0x12b   :  { %v1014_v35 = vpop.f32.mrb[0].mxu0 }
 0x12c   :  { %v1015_v37 = vpop.f32.mrb[1].mxu0  ;;  %v1036_v38 = vpop.f32.mrb[0].mxu1 }
 0x12d   :  { %v1016_v39 = vadd.f32 %v1015_v37, %v1014_v35  ;;  %v1017_v40 = vpop.f32.mrb[2].mxu0  ;;  %v1037_v41 = vpop.f32.mrb[1].mxu1 }
 0x12e   :  { %v1018_v42 = vpop.f32.mrb[3].mxu0  ;;  %v1038_v44 = vadd.f32 %v1037_v41, %v1036_v38  ;;  %v1039_v45 = vpop.f32.mrb[2].mxu1 }
 0x12f   :  { %v669_v43 = vadd.f32 %v1016_v39, %v924_v36  ;;  %v1040_v46 = vpop.f32.mrb[3].mxu1 }
 0x131   :  { %v709_v47 = vadd.f32 %v1038_v44, %v669_v43 }
 0x14b   :  { %v1058_v48 = vpop.f32.mrb[4].mxu0 }
 0x14c   :  { %v1059_v49 = vpop.f32.mrb[5].mxu0  ;;  %v1080_v50 = vpop.f32.mrb[4].mxu1 }
 0x14d   :  { %v1060_v51 = vadd.f32 %v1059_v49, %v1058_v48  ;;  %v1061_v52 = vpop.f32.mrb[6].mxu0  ;;  %v1081_v53 = vpop.f32.mrb[5].mxu1 }
 0x14e   :  { %v1062_v54 = vpop.f32.mrb[7].mxu0  ;;  %v1082_v56 = vadd.f32 %v1081_v53, %v1080_v50  ;;  %v1083_v57 = vpop.f32.mrb[6].mxu1 }
 0x14f   :  { %v749_v55 = vadd.f32 %v1060_v51, %v709_v47  ;;  %v1084_v58 = vpop.f32.mrb[7].mxu1 }
 0x151   :  { %v789_v59 = vadd.f32 %v1082_v56, %v749_v55 }
 0x153   :  { %v794_v60 = vmax.f32 %v789_v59, 0.0 }
 0x155   :  { %v795_v61 = vpack.c.bf16 %v794_v60, %v794_v60 }
 0x157   :  { %1112 = vmatmul.mubr.bf16.vlgmr.msra.gmra.mrb[8].mxu0 %v795_v61 }
 0x22a   :  { %v901_v63 = vpop.f32.mrb[8].mxu0 }
 0x22b   :  { %v902_v0 = vadd.f32 %v989_v62, %v901_v63  ;;  %v1113_v1 = vpop.f32.mrb[9].mxu0 }
 0x22c   :  { %v904_v2 = vpop.f32.mrb[10].mxu0 }
 0x22d   :  { %907 = vst [vmem:[#allocation8] sm:$0x3] %v902_v0  ;;  %v1114_v3 = vpop.f32.mrb[11].mxu0 }
 0x22e   :  { %1275 = shalt.err (!%p1272_p0)
}
 0x22f   :  { %s1276_s4 = scalar_lea.hbm %s1402_s5, 32 }
 0x230   :  { %p1277_p1 = scmp.ne.s32.totalorder %s1402_s5, %s1276_s4  ;;  %p1280_p2 = scmp.lt.u32.totalorder %s1276_s4, %s1402_s5 }
 0x232   :  { %p1282_p3 = pnand %p1280_p2, %p1277_p1 }
 0x234   :  { %1285 = shalt.err (!%p1282_p3)
}
 0x235   :  { %917 = dma.vmem_to_hbm [thread:$0]  %s915_s7, 32, %s1402_s5, [#allocation4]  }
 0x236   :  { %1290 = dma.done.wait [#allocation4], 32  }
 0x237   :  { %1291 = vsyncadd [#allocation4], 4294967264 }
 0x238   :  { %921 = vsyncpa [#allocation3], 1 }
 0x239   :  { %922 = vsyncpa [#allocation6], 1 }
 0x23a   :  { %923 = vsyncpa [#allocation4], 1 }

</bundles_post_ra>
